<compile_context>
chip_gen: v7x
topology: tpu7x:2x2x1
jax: 0.10.0
libtpu: 0.0.40
codegen_flags: <defaults>
</compile_context>

<pallas_src>
import functools

import jax
import jax.numpy as jnp
import numpy as np
from jax.experimental import pallas as pl
from jax.experimental.pallas import tpu as pltpu


def _round_up(v, m):
    return ((v + m - 1) // m) * m


def _fused_conv_block_kernel(x_ref, w1_ref, w2_ref, o_ref, pbuf, *, W, pad):
    """One batch element: conv1 -> IN -> LReLU -> conv2 -> IN -> LReLU.

    x_ref : (1, Cin, L)      flat NCHW input, L = H*W (lane-dense)
    w1_ref: (9, Cout, Cin)   bf16 tap-major weights, tap t = dy*3 + dx
    w2_ref: (9, Cout, Cout)  bf16 tap-major weights
    o_ref : (1, Cout, L)     flat NCHW output (lane-dense store)
    pbuf  : (max(Cin,Cout), pad + L + pad) bf16, reused by both stages
    """
    L = x_ref.shape[-1]
    cin = x_ref.shape[1]
    cout = w1_ref.shape[1]

    # Column-wrap masks, built in-kernel (no HBM inputs / BlockSpec plumbing).
    col = jax.lax.broadcasted_iota(jnp.int32, (1, L), 1) % W
    not_left = col != 0          # kill dx==0 taps that wrapped from the previous row
    not_right = col != (W - 1)   # kill dx==2 taps that wrapped into the next row

    # Zero only the halo columns (cheap: 2*pad cols).  Re-done every grid step so
    # correctness never depends on scratch persistence across grid iterations
    # (each TensorCore of a core-split "parallel" axis has its own scratch).
    zeros_halo = jnp.zeros((pbuf.shape[0], pad), pbuf.dtype)
    pbuf[:, :pad] = zeros_halo
    pbuf[:, pad + L:] = zeros_halo

    def conv_in_lrelu(c_in, w_ref):
        # 3x3 "SAME" conv as 9 accumulating tap matmuls straight from pbuf
        # (no materialized im2col).  bf16 MXU operands, f32 accumulation.
        acc = None
        for dy in range(3):
            for dx in range(3):
                s = pad - (W + 1) + dy * W + dx          # static slice start
                tap = pbuf[:c_in, s:s + L]               # bf16 (c_in, L)
                if dx == 0:
                    tap = jnp.where(not_left, tap, jnp.zeros_like(tap))
                elif dx == 2:
                    tap = jnp.where(not_right, tap, jnp.zeros_like(tap))
                t = dy * 3 + dx
                part = jax.lax.dot_general(
                    w_ref[t], tap, (((1,), (0,)), ((), ())),
                    preferred_element_type=jnp.float32)
                acc = part if acc is None else acc + part
        # Conv bias omitted: per-channel constant cancels under affine=False IN.
        # InstanceNorm2d (affine=False, eps=1e-5), single-pass mean/var.
        inv_l = 1.0 / L
        mean = jnp.sum(acc, axis=1, keepdims=True) * inv_l
        var = jnp.sum(acc * acc, axis=1, keepdims=True) * inv_l - mean * mean
        var = jnp.maximum(var, 0.0)
        y = (acc - mean) * jax.lax.rsqrt(var + 1e-5)
        # LeakyReLU(0.1)
        return jnp.where(y >= 0.0, y, 0.1 * y)

    # ---- stage 1 ----
    pbuf[:cin, pad:pad + L] = x_ref[0].astype(pbuf.dtype)
    y1 = conv_in_lrelu(cin, w1_ref)

    # ---- stage 2: normalized stage-1 activation goes straight back into the
    # reused buffer's interior (stays in VMEM, never touches HBM) ----
    pbuf[:cout, pad:pad + L] = y1.astype(pbuf.dtype)
    y2 = conv_in_lrelu(cout, w2_ref)

    o_ref[...] = y2[None].astype(o_ref.dtype)


def _pack_weight(w_hwio):
    # HWIO (3,3,Ci,Co) -> (9, Co, Ci) tap-major bf16 slab (tap t = dy*3 + dx).
    kh, kw, ci, co = w_hwio.shape
    w = jnp.transpose(w_hwio, (0, 1, 3, 2)).reshape(kh * kw, co, ci)
    return w.astype(jnp.bfloat16)


def init_conv_block_params(key, in_ch, out_ch):
    """Deterministic synthetic parameters (PyTorch-equivalent shapes).

    Weights stored HWIO = (3, 3, Cin, Cout); PyTorch OIHW weight w_t maps via
    w_hwio = transpose(w_t, (2, 3, 1, 0)).
    """
    k1, k2, k3, k4 = jax.random.split(key, 4)
    w1 = (jax.random.normal(k1, (3, 3, in_ch, out_ch), jnp.float32)
          * (1.0 / np.sqrt(9 * in_ch)))
    b1 = jax.random.normal(k2, (out_ch,), jnp.float32) * 0.05
    w2 = (jax.random.normal(k3, (3, 3, out_ch, out_ch), jnp.float32)
          * (1.0 / np.sqrt(9 * out_ch)))
    b2 = jax.random.normal(k4, (out_ch,), jnp.float32) * 0.05
    return {"w1": w1, "b1": b1, "w2": w2, "b2": b2}


@jax.jit
def conv_block_forward(x_nchw, params):
    """Fused Pallas forward. Input/output are NCHW (PyTorch convention)."""
    N, Cin, H, W = x_nchw.shape
    Cout = params["w1"].shape[-1]
    L = H * W
    pad = _round_up(W + 1, 128)       # halo >= one row + 1, lane-aligned interior
    cmax = max(Cin, Cout)

    x_flat = x_nchw.reshape(N, Cin, L)       # free reshape (no transpose)
    w1m = _pack_weight(params["w1"])         # (9, Cout, Cin)  bf16
    w2m = _pack_weight(params["w2"])         # (9, Cout, Cout) bf16
    # Conv biases are intentionally NOT passed: they cancel under affine-free IN.

    # Explicit VMEM budget: reused bf16 pbuf + double-buffered in/out blocks +
    # weights + generous allowance for the f32 accumulator / temporaries.
    est = (cmax * (2 * pad + L) * 2          # pbuf (bf16)
           + 2 * Cin * L * 4                 # input block, double-buffered
           + 2 * Cout * L * 4                # output block, double-buffered
           + 2 * (w1m.size + w2m.size) * 2   # weight blocks, double-buffered
           + 6 * Cout * L * 4)               # acc / y / tap temporaries
    vmem_limit = min(max(int(1.5 * est) + (2 << 20), 16 << 20), 64 << 20)

    kernel = functools.partial(_fused_conv_block_kernel, W=W, pad=pad)
    out_flat = pl.pallas_call(
        kernel,
        out_shape=jax.ShapeDtypeStruct((N, Cout, L), x_nchw.dtype),
        grid_spec=pltpu.PrefetchScalarGridSpec(
            num_scalar_prefetch=0,
            grid=(N,),
            in_specs=[
                pl.BlockSpec((1, Cin, L), lambda n: (n, 0, 0)),
                pl.BlockSpec((9, Cout, Cin), lambda n: (0, 0, 0)),
                pl.BlockSpec((9, Cout, Cout), lambda n: (0, 0, 0)),
            ],
            out_specs=pl.BlockSpec((1, Cout, L), lambda n: (n, 0, 0)),
            scratch_shapes=[
                # Single reused, zero-halo padded activation buffer (both stages).
                pltpu.VMEM((cmax, 2 * pad + L), jnp.bfloat16),
            ],
        ),
        compiler_params=pltpu.CompilerParams(
            dimension_semantics=("parallel",),
            vmem_limit_bytes=vmem_limit),
    )(x_flat, w1m, w2m)
    return out_flat.reshape(N, Cout, H, W)   # free reshape (no transpose)


def _ref_forward(x_nchw, params):
    """Pure-JAX f32 reference (no Pallas), matching PyTorch exactly (incl. bias)."""
    x = jnp.transpose(x_nchw, (0, 2, 3, 1))

    def stage(x, w, b):
        y = jax.lax.conv_general_dilated(
            x, w, window_strides=(1, 1), padding="SAME",
            dimension_numbers=("NHWC", "HWIO", "NHWC"),
            precision=jax.lax.Precision.HIGHEST)
        y = y + b[None, None, None, :]
        mean = jnp.mean(y, axis=(1, 2), keepdims=True)
        var = jnp.mean(jnp.square(y - mean), axis=(1, 2), keepdims=True)
        y = (y - mean) / jnp.sqrt(var + 1e-5)
        return jnp.where(y >= 0, y, 0.1 * y)

    x = stage(x, params["w1"], params["b1"])
    x = stage(x, params["w2"], params["b2"])
    return jnp.transpose(x, (0, 3, 1, 2))


if __name__ == "__main__":
    key = jax.random.PRNGKey(0)
    kx, kp = jax.random.split(key)

    N, in_ch, out_ch, H, W = 2, 4, 8, 16, 16
    x = jax.random.normal(kx, (N, in_ch, H, W), jnp.float32)
    params = init_conv_block_params(kp, in_ch, out_ch)

    out = jax.block_until_ready(conv_block_forward(x, params))
    ref = jax.block_until_ready(_ref_forward(x, params))

    assert out.shape == (N, out_ch, H, W), out.shape
    max_err = float(jnp.max(jnp.abs(out - ref)))
    # bf16 MXU operands; InstanceNorm renormalizes so rounding stays small, but
    # above pure-f32 levels -> 5e-2 tolerance.  (Reference includes the conv
    # biases; the kernel omits them, demonstrating the exact cancellation.)
    assert max_err < 5e-2, f"max abs error too large: {max_err}"

    print("KERNEL_OK")
</pallas_src>

<mosaic_0001>
module attributes {stable_mosaic.version = 11 : i64} {
  func.func @_fused_conv_block_kernel(%arg0: i32, %arg1: memref<1x4x256xf32, #tpu.memory_space<vmem>>, %arg2: memref<9x8x4xbf16, #tpu.memory_space<vmem>>, %arg3: memref<9x8x8xbf16, #tpu.memory_space<vmem>>, %arg4: memref<1x8x256xf32, #tpu.memory_space<vmem>>, %arg5: memref<8x512xbf16, #tpu.memory_space<vmem>>) attributes {dimension_semantics = [#tpu.dimension_semantics<parallel>], iteration_bounds = array<i64: 2>, scalar_prefetch = 0 : i64, scratch_operands = 1 : i64, tpu.core_type = #tpu.core_type<tc>, window_params = [{transform_indices = @transform_0, window_bounds = array<i64: 1, 4, 256>}, {pipeline_mode = #tpu.pipeline_mode<synchronous>, transform_indices = @transform_1, window_bounds = array<i64: 9, 8, 4>}, {pipeline_mode = #tpu.pipeline_mode<synchronous>, transform_indices = @transform_2, window_bounds = array<i64: 9, 8, 8>}, {transform_indices = @transform_3, window_bounds = array<i64: 1, 8, 256>}]} {
    %0 = tpu.iota {dimensions = array<i32: 1>} : vector<1x256xi32>
    %c16_i32 = arith.constant 16 : i32
    %c0_i32 = arith.constant 0 : i32
    %1 = arith.cmpi eq, %c16_i32, %c0_i32 : i32
    %c1_i32 = arith.constant 1 : i32
    %2 = arith.select %1, %c1_i32, %c16_i32 : i32
    %3 = vector.broadcast %2 : i32 to vector<1x256xi32>
    %4 = arith.remsi %0, %3 : vector<1x256xi32>
    %c0_i32_0 = arith.constant 0 : i32
    %5 = vector.broadcast %c0_i32_0 : i32 to vector<1x256xi32>
    %6 = arith.cmpi ne, %4, %5 : vector<1x256xi32>
    %c0_i32_1 = arith.constant 0 : i32
    %7 = vector.broadcast %c0_i32_1 : i32 to vector<1x256xi32>
    %8 = arith.cmpi slt, %4, %7 : vector<1x256xi32>
    %c0_i32_2 = arith.constant 0 : i32
    %9 = arith.cmpi slt, %2, %c0_i32_2 : i32
    %10 = vector.broadcast %9 : i1 to vector<1x256xi1>
    %11 = vector.broadcast %10 : vector<1x256xi1> to vector<1x256xi1>
    %12 = arith.xori %8, %11 : vector<1x256xi1>
    %13 = arith.andi %12, %6 : vector<1x256xi1>
    %14 = vector.broadcast %2 : i32 to vector<1x256xi32>
    %15 = arith.addi %4, %14 : vector<1x256xi32>
    %16 = arith.select %13, %15, %4 : vector<1x256xi1>, vector<1x256xi32>
    %c0_i32_3 = arith.constant 0 : i32
    %17 = vector.broadcast %c0_i32_3 : i32 to vector<1x256xi32>
    %18 = arith.cmpi ne, %16, %17 : vector<1x256xi32>
    %c15_i32 = arith.constant 15 : i32
    %19 = vector.broadcast %c15_i32 : i32 to vector<1x256xi32>
    %20 = arith.cmpi ne, %16, %19 : vector<1x256xi32>
    %cst = arith.constant 0.000000e+00 : bf16
    %21 = vector.broadcast %cst : bf16 to vector<8x128xbf16>
    %c0 = arith.constant 0 : index
    %c0_4 = arith.constant 0 : index
    %22 = vector.load %arg5[%c0, %c0_4] : memref<8x512xbf16, #tpu.memory_space<vmem>>, vector<8x128xbf16>
    tpu.vector_store %arg5[%c0, %c0_4], %21 {strides = array<i32>} : memref<8x512xbf16, #tpu.memory_space<vmem>>, vector<8x128xbf16>,
    %c0_5 = arith.constant 0 : index
    %c384 = arith.constant 384 : index
    %23 = vector.load %arg5[%c0_5, %c384] : memref<8x512xbf16, #tpu.memory_space<vmem>>, vector<8x128xbf16>
    tpu.vector_store %arg5[%c0_5, %c384], %21 {strides = array<i32>} : memref<8x512xbf16, #tpu.memory_space<vmem>>, vector<8x128xbf16>,
    %c0_6 = arith.constant 0 : index
    %c0_7 = arith.constant 0 : index
    %c0_8 = arith.constant 0 : index
    %24 = vector.load %arg1[%c0_6, %c0_7, %c0_8] : memref<1x4x256xf32, #tpu.memory_space<vmem>>, vector<1x4x256xf32>
    %25 = vector.shape_cast %24 : vector<1x4x256xf32> to vector<4x256xf32>
    %26 = arith.truncf %25 : vector<4x256xf32> to vector<4x256xbf16>
    %c0_9 = arith.constant 0 : index
    %c128 = arith.constant 128 : index
    %27 = vector.load %arg5[%c0_9, %c128] : memref<8x512xbf16, #tpu.memory_space<vmem>>, vector<4x256xbf16>
    tpu.vector_store %arg5[%c0_9, %c128], %26 {strides = array<i32>} : memref<8x512xbf16, #tpu.memory_space<vmem>>, vector<4x256xbf16>,
    %c0_10 = arith.constant 0 : index
    %c111 = arith.constant 111 : index
    %28 = vector.load %arg5[%c0_10, %c111] : memref<8x512xbf16, #tpu.memory_space<vmem>>, vector<4x256xbf16>
    %cst_11 = arith.constant 0.000000e+00 : bf16
    %29 = vector.broadcast %cst_11 : bf16 to vector<4x256xbf16>
    %30 = vector.shape_cast %18 : vector<1x256xi1> to vector<1x256xi1>
    %31 = vector.broadcast %30 : vector<1x256xi1> to vector<4x256xi1>
    %32 = arith.select %31, %28, %29 : vector<4x256xi1>, vector<4x256xbf16>
    %c0_12 = arith.constant 0 : index
    %c0_13 = arith.constant 0 : index
    %c0_14 = arith.constant 0 : index
    %33 = vector.load %arg2[%c0_12, %c0_13, %c0_14] : memref<9x8x4xbf16, #tpu.memory_space<vmem>>, vector<1x8x4xbf16>
    %34 = vector.shape_cast %33 : vector<1x8x4xbf16> to vector<8x4xbf16>
    %cst_15 = arith.constant dense<0.000000e+00> : vector<8x256xf32>
    %35 = tpu.matmul %34, %32, %cst_15 {dimension_numbers = #tpu.dot_dimension_numbers<[1], [0], [0], [1], [0, 0, 1, 1], [], []>} : vector<8x4xbf16>, vector<4x256xbf16>, vector<8x256xf32> -> vector<8x256xf32>
    %c0_16 = arith.constant 0 : index
    %c112 = arith.constant 112 : index
    %36 = vector.load %arg5[%c0_16, %c112] : memref<8x512xbf16, #tpu.memory_space<vmem>>, vector<4x256xbf16>
    %c1 = arith.constant 1 : index
    %c0_17 = arith.constant 0 : index
    %c0_18 = arith.constant 0 : index
    %37 = vector.load %arg2[%c1, %c0_17, %c0_18] : memref<9x8x4xbf16, #tpu.memory_space<vmem>>, vector<1x8x4xbf16>
    %38 = vector.shape_cast %37 : vector<1x8x4xbf16> to vector<8x4xbf16>
    %cst_19 = arith.constant dense<0.000000e+00> : vector<8x256xf32>
    %39 = tpu.matmul %38, %36, %cst_19 {dimension_numbers = #tpu.dot_dimension_numbers<[1], [0], [0], [1], [0, 0, 1, 1], [], []>} : vector<8x4xbf16>, vector<4x256xbf16>, vector<8x256xf32> -> vector<8x256xf32>
    %40 = arith.addf %35, %39 : vector<8x256xf32>
    %c0_20 = arith.constant 0 : index
    %c113 = arith.constant 113 : index
    %41 = vector.load %arg5[%c0_20, %c113] : memref<8x512xbf16, #tpu.memory_space<vmem>>, vector<4x256xbf16>
    %cst_21 = arith.constant 0.000000e+00 : bf16
    %42 = vector.broadcast %cst_21 : bf16 to vector<4x256xbf16>
    %43 = vector.shape_cast %20 : vector<1x256xi1> to vector<1x256xi1>
    %44 = vector.broadcast %43 : vector<1x256xi1> to vector<4x256xi1>
    %45 = arith.select %44, %41, %42 : vector<4x256xi1>, vector<4x256xbf16>
    %c2 = arith.constant 2 : index
    %c0_22 = arith.constant 0 : index
    %c0_23 = arith.constant 0 : index
    %46 = vector.load %arg2[%c2, %c0_22, %c0_23] : memref<9x8x4xbf16, #tpu.memory_space<vmem>>, vector<1x8x4xbf16>
    %47 = vector.shape_cast %46 : vector<1x8x4xbf16> to vector<8x4xbf16>
    %cst_24 = arith.constant dense<0.000000e+00> : vector<8x256xf32>
    %48 = tpu.matmul %47, %45, %cst_24 {dimension_numbers = #tpu.dot_dimension_numbers<[1], [0], [0], [1], [0, 0, 1, 1], [], []>} : vector<8x4xbf16>, vector<4x256xbf16>, vector<8x256xf32> -> vector<8x256xf32>
    %49 = arith.addf %40, %48 : vector<8x256xf32>
    %c0_25 = arith.constant 0 : index
    %c127 = arith.constant 127 : index
    %50 = vector.load %arg5[%c0_25, %c127] : memref<8x512xbf16, #tpu.memory_space<vmem>>, vector<4x256xbf16>
    %cst_26 = arith.constant 0.000000e+00 : bf16
    %51 = vector.broadcast %cst_26 : bf16 to vector<4x256xbf16>
    %52 = vector.shape_cast %18 : vector<1x256xi1> to vector<1x256xi1>
    %53 = vector.broadcast %52 : vector<1x256xi1> to vector<4x256xi1>
    %54 = arith.select %53, %50, %51 : vector<4x256xi1>, vector<4x256xbf16>
    %c3 = arith.constant 3 : index
    %c0_27 = arith.constant 0 : index
    %c0_28 = arith.constant 0 : index
    %55 = vector.load %arg2[%c3, %c0_27, %c0_28] : memref<9x8x4xbf16, #tpu.memory_space<vmem>>, vector<1x8x4xbf16>
    %56 = vector.shape_cast %55 : vector<1x8x4xbf16> to vector<8x4xbf16>
    %cst_29 = arith.constant dense<0.000000e+00> : vector<8x256xf32>
    %57 = tpu.matmul %56, %54, %cst_29 {dimension_numbers = #tpu.dot_dimension_numbers<[1], [0], [0], [1], [0, 0, 1, 1], [], []>} : vector<8x4xbf16>, vector<4x256xbf16>, vector<8x256xf32> -> vector<8x256xf32>
    %58 = arith.addf %49, %57 : vector<8x256xf32>
    %c0_30 = arith.constant 0 : index
    %c128_31 = arith.constant 128 : index
    %59 = vector.load %arg5[%c0_30, %c128_31] : memref<8x512xbf16, #tpu.memory_space<vmem>>, vector<4x256xbf16>
    %c4 = arith.constant 4 : index
    %c0_32 = arith.constant 0 : index
    %c0_33 = arith.constant 0 : index
    %60 = vector.load %arg2[%c4, %c0_32, %c0_33] : memref<9x8x4xbf16, #tpu.memory_space<vmem>>, vector<1x8x4xbf16>
    %61 = vector.shape_cast %60 : vector<1x8x4xbf16> to vector<8x4xbf16>
    %cst_34 = arith.constant dense<0.000000e+00> : vector<8x256xf32>
    %62 = tpu.matmul %61, %59, %cst_34 {dimension_numbers = #tpu.dot_dimension_numbers<[1], [0], [0], [1], [0, 0, 1, 1], [], []>} : vector<8x4xbf16>, vector<4x256xbf16>, vector<8x256xf32> -> vector<8x256xf32>
    %63 = arith.addf %58, %62 : vector<8x256xf32>
    %c0_35 = arith.constant 0 : index
    %c129 = arith.constant 129 : index
    %64 = vector.load %arg5[%c0_35, %c129] : memref<8x512xbf16, #tpu.memory_space<vmem>>, vector<4x256xbf16>
    %cst_36 = arith.constant 0.000000e+00 : bf16
    %65 = vector.broadcast %cst_36 : bf16 to vector<4x256xbf16>
    %66 = vector.shape_cast %20 : vector<1x256xi1> to vector<1x256xi1>
    %67 = vector.broadcast %66 : vector<1x256xi1> to vector<4x256xi1>
    %68 = arith.select %67, %64, %65 : vector<4x256xi1>, vector<4x256xbf16>
    %c5 = arith.constant 5 : index
    %c0_37 = arith.constant 0 : index
    %c0_38 = arith.constant 0 : index
    %69 = vector.load %arg2[%c5, %c0_37, %c0_38] : memref<9x8x4xbf16, #tpu.memory_space<vmem>>, vector<1x8x4xbf16>
    %70 = vector.shape_cast %69 : vector<1x8x4xbf16> to vector<8x4xbf16>
    %cst_39 = arith.constant dense<0.000000e+00> : vector<8x256xf32>
    %71 = tpu.matmul %70, %68, %cst_39 {dimension_numbers = #tpu.dot_dimension_numbers<[1], [0], [0], [1], [0, 0, 1, 1], [], []>} : vector<8x4xbf16>, vector<4x256xbf16>, vector<8x256xf32> -> vector<8x256xf32>
    %72 = arith.addf %63, %71 : vector<8x256xf32>
    %c0_40 = arith.constant 0 : index
    %c143 = arith.constant 143 : index
    %73 = vector.load %arg5[%c0_40, %c143] : memref<8x512xbf16, #tpu.memory_space<vmem>>, vector<4x256xbf16>
    %cst_41 = arith.constant 0.000000e+00 : bf16
    %74 = vector.broadcast %cst_41 : bf16 to vector<4x256xbf16>
    %75 = vector.shape_cast %18 : vector<1x256xi1> to vector<1x256xi1>
    %76 = vector.broadcast %75 : vector<1x256xi1> to vector<4x256xi1>
    %77 = arith.select %76, %73, %74 : vector<4x256xi1>, vector<4x256xbf16>
    %c6 = arith.constant 6 : index
    %c0_42 = arith.constant 0 : index
    %c0_43 = arith.constant 0 : index
    %78 = vector.load %arg2[%c6, %c0_42, %c0_43] : memref<9x8x4xbf16, #tpu.memory_space<vmem>>, vector<1x8x4xbf16>
    %79 = vector.shape_cast %78 : vector<1x8x4xbf16> to vector<8x4xbf16>
    %cst_44 = arith.constant dense<0.000000e+00> : vector<8x256xf32>
    %80 = tpu.matmul %79, %77, %cst_44 {dimension_numbers = #tpu.dot_dimension_numbers<[1], [0], [0], [1], [0, 0, 1, 1], [], []>} : vector<8x4xbf16>, vector<4x256xbf16>, vector<8x256xf32> -> vector<8x256xf32>
    %81 = arith.addf %72, %80 : vector<8x256xf32>
    %c0_45 = arith.constant 0 : index
    %c144 = arith.constant 144 : index
    %82 = vector.load %arg5[%c0_45, %c144] : memref<8x512xbf16, #tpu.memory_space<vmem>>, vector<4x256xbf16>
    %c7 = arith.constant 7 : index
    %c0_46 = arith.constant 0 : index
    %c0_47 = arith.constant 0 : index
    %83 = vector.load %arg2[%c7, %c0_46, %c0_47] : memref<9x8x4xbf16, #tpu.memory_space<vmem>>, vector<1x8x4xbf16>
    %84 = vector.shape_cast %83 : vector<1x8x4xbf16> to vector<8x4xbf16>
    %cst_48 = arith.constant dense<0.000000e+00> : vector<8x256xf32>
    %85 = tpu.matmul %84, %82, %cst_48 {dimension_numbers = #tpu.dot_dimension_numbers<[1], [0], [0], [1], [0, 0, 1, 1], [], []>} : vector<8x4xbf16>, vector<4x256xbf16>, vector<8x256xf32> -> vector<8x256xf32>
    %86 = arith.addf %81, %85 : vector<8x256xf32>
    %c0_49 = arith.constant 0 : index
    %c145 = arith.constant 145 : index
    %87 = vector.load %arg5[%c0_49, %c145] : memref<8x512xbf16, #tpu.memory_space<vmem>>, vector<4x256xbf16>
    %cst_50 = arith.constant 0.000000e+00 : bf16
    %88 = vector.broadcast %cst_50 : bf16 to vector<4x256xbf16>
    %89 = vector.shape_cast %20 : vector<1x256xi1> to vector<1x256xi1>
    %90 = vector.broadcast %89 : vector<1x256xi1> to vector<4x256xi1>
    %91 = arith.select %90, %87, %88 : vector<4x256xi1>, vector<4x256xbf16>
    %c8 = arith.constant 8 : index
    %c0_51 = arith.constant 0 : index
    %c0_52 = arith.constant 0 : index
    %92 = vector.load %arg2[%c8, %c0_51, %c0_52] : memref<9x8x4xbf16, #tpu.memory_space<vmem>>, vector<1x8x4xbf16>
    %93 = vector.shape_cast %92 : vector<1x8x4xbf16> to vector<8x4xbf16>
    %cst_53 = arith.constant dense<0.000000e+00> : vector<8x256xf32>
    %94 = tpu.matmul %93, %91, %cst_53 {dimension_numbers = #tpu.dot_dimension_numbers<[1], [0], [0], [1], [0, 0, 1, 1], [], []>} : vector<8x4xbf16>, vector<4x256xbf16>, vector<8x256xf32> -> vector<8x256xf32>
    %95 = arith.addf %86, %94 : vector<8x256xf32>
    %cst_54 = arith.constant dense<0.000000e+00> : vector<8xf32>
    %96 = vector.multi_reduction <add>, %95, %cst_54 [1] : vector<8x256xf32> to vector<8xf32>
    %97 = vector.shape_cast %96 : vector<8xf32> to vector<8x1xf32>
    %cst_55 = arith.constant 3.906250e-03 : f32
    %98 = vector.broadcast %cst_55 : f32 to vector<8x1xf32>
    %99 = arith.mulf %97, %98 : vector<8x1xf32>
    %100 = arith.mulf %95, %95 : vector<8x256xf32>
    %cst_56 = arith.constant dense<0.000000e+00> : vector<8xf32>
    %101 = vector.multi_reduction <add>, %100, %cst_56 [1] : vector<8x256xf32> to vector<8xf32>
    %102 = vector.shape_cast %101 : vector<8xf32> to vector<8x1xf32>
    %cst_57 = arith.constant 3.906250e-03 : f32
    %103 = vector.broadcast %cst_57 : f32 to vector<8x1xf32>
    %104 = arith.mulf %102, %103 : vector<8x1xf32>
    %105 = arith.mulf %99, %99 : vector<8x1xf32>
    %106 = arith.subf %104, %105 : vector<8x1xf32>
    %cst_58 = arith.constant 0.000000e+00 : f32
    %107 = vector.broadcast %cst_58 : f32 to vector<8x1xf32>
    %108 = arith.maximumf %106, %107 : vector<8x1xf32>
    %109 = vector.broadcast %99 : vector<8x1xf32> to vector<8x256xf32>
    %110 = arith.subf %95, %109 : vector<8x256xf32>
    %cst_59 = arith.constant 9.99999974E-6 : f32
    %111 = vector.broadcast %cst_59 : f32 to vector<8x1xf32>
    %112 = arith.addf %108, %111 : vector<8x1xf32>
    %113 = math.rsqrt %112 : vector<8x1xf32>
    %114 = vector.broadcast %113 : vector<8x1xf32> to vector<8x256xf32>
    %115 = arith.mulf %110, %114 : vector<8x256xf32>
    %cst_60 = arith.constant 0.000000e+00 : f32
    %116 = vector.broadcast %cst_60 : f32 to vector<8x256xf32>
    %117 = arith.cmpf oge, %115, %116 : vector<8x256xf32>
    %cst_61 = arith.constant 1.000000e-01 : f32
    %118 = vector.broadcast %cst_61 : f32 to vector<8x256xf32>
    %119 = arith.mulf %118, %115 : vector<8x256xf32>
    %120 = arith.select %117, %115, %119 : vector<8x256xi1>, vector<8x256xf32>
    %121 = arith.truncf %120 : vector<8x256xf32> to vector<8x256xbf16>
    %c0_62 = arith.constant 0 : index
    %c128_63 = arith.constant 128 : index
    %122 = vector.load %arg5[%c0_62, %c128_63] : memref<8x512xbf16, #tpu.memory_space<vmem>>, vector<8x256xbf16>
    tpu.vector_store %arg5[%c0_62, %c128_63], %121 {strides = array<i32>} : memref<8x512xbf16, #tpu.memory_space<vmem>>, vector<8x256xbf16>,
    %c0_64 = arith.constant 0 : index
    %c111_65 = arith.constant 111 : index
    %123 = vector.load %arg5[%c0_64, %c111_65] : memref<8x512xbf16, #tpu.memory_space<vmem>>, vector<8x256xbf16>
    %cst_66 = arith.constant 0.000000e+00 : bf16
    %124 = vector.broadcast %cst_66 : bf16 to vector<8x256xbf16>
    %125 = vector.shape_cast %18 : vector<1x256xi1> to vector<1x256xi1>
    %126 = vector.broadcast %125 : vector<1x256xi1> to vector<8x256xi1>
    %127 = arith.select %126, %123, %124 : vector<8x256xi1>, vector<8x256xbf16>
    %c0_67 = arith.constant 0 : index
    %c0_68 = arith.constant 0 : index
    %c0_69 = arith.constant 0 : index
    %128 = vector.load %arg3[%c0_67, %c0_68, %c0_69] : memref<9x8x8xbf16, #tpu.memory_space<vmem>>, vector<1x8x8xbf16>
    %129 = vector.shape_cast %128 : vector<1x8x8xbf16> to vector<8x8xbf16>
    %cst_70 = arith.constant dense<0.000000e+00> : vector<8x256xf32>
    %130 = tpu.matmul %129, %127, %cst_70 {dimension_numbers = #tpu.dot_dimension_numbers<[1], [0], [0], [1], [0, 0, 1, 1], [], []>} : vector<8x8xbf16>, vector<8x256xbf16>, vector<8x256xf32> -> vector<8x256xf32>
    %c0_71 = arith.constant 0 : index
    %c112_72 = arith.constant 112 : index
    %131 = vector.load %arg5[%c0_71, %c112_72] : memref<8x512xbf16, #tpu.memory_space<vmem>>, vector<8x256xbf16>
    %c1_73 = arith.constant 1 : index
    %c0_74 = arith.constant 0 : index
    %c0_75 = arith.constant 0 : index
    %132 = vector.load %arg3[%c1_73, %c0_74, %c0_75] : memref<9x8x8xbf16, #tpu.memory_space<vmem>>, vector<1x8x8xbf16>
    %133 = vector.shape_cast %132 : vector<1x8x8xbf16> to vector<8x8xbf16>
    %cst_76 = arith.constant dense<0.000000e+00> : vector<8x256xf32>
    %134 = tpu.matmul %133, %131, %cst_76 {dimension_numbers = #tpu.dot_dimension_numbers<[1], [0], [0], [1], [0, 0, 1, 1], [], []>} : vector<8x8xbf16>, vector<8x256xbf16>, vector<8x256xf32> -> vector<8x256xf32>
    %135 = arith.addf %130, %134 : vector<8x256xf32>
    %c0_77 = arith.constant 0 : index
    %c113_78 = arith.constant 113 : index
    %136 = vector.load %arg5[%c0_77, %c113_78] : memref<8x512xbf16, #tpu.memory_space<vmem>>, vector<8x256xbf16>
    %cst_79 = arith.constant 0.000000e+00 : bf16
    %137 = vector.broadcast %cst_79 : bf16 to vector<8x256xbf16>
    %138 = vector.shape_cast %20 : vector<1x256xi1> to vector<1x256xi1>
    %139 = vector.broadcast %138 : vector<1x256xi1> to vector<8x256xi1>
    %140 = arith.select %139, %136, %137 : vector<8x256xi1>, vector<8x256xbf16>
    %c2_80 = arith.constant 2 : index
    %c0_81 = arith.constant 0 : index
    %c0_82 = arith.constant 0 : index
    %141 = vector.load %arg3[%c2_80, %c0_81, %c0_82] : memref<9x8x8xbf16, #tpu.memory_space<vmem>>, vector<1x8x8xbf16>
    %142 = vector.shape_cast %141 : vector<1x8x8xbf16> to vector<8x8xbf16>
    %cst_83 = arith.constant dense<0.000000e+00> : vector<8x256xf32>
    %143 = tpu.matmul %142, %140, %cst_83 {dimension_numbers = #tpu.dot_dimension_numbers<[1], [0], [0], [1], [0, 0, 1, 1], [], []>} : vector<8x8xbf16>, vector<8x256xbf16>, vector<8x256xf32> -> vector<8x256xf32>
    %144 = arith.addf %135, %143 : vector<8x256xf32>
    %c0_84 = arith.constant 0 : index
    %c127_85 = arith.constant 127 : index
    %145 = vector.load %arg5[%c0_84, %c127_85] : memref<8x512xbf16, #tpu.memory_space<vmem>>, vector<8x256xbf16>
    %cst_86 = arith.constant 0.000000e+00 : bf16
    %146 = vector.broadcast %cst_86 : bf16 to vector<8x256xbf16>
    %147 = vector.shape_cast %18 : vector<1x256xi1> to vector<1x256xi1>
    %148 = vector.broadcast %147 : vector<1x256xi1> to vector<8x256xi1>
    %149 = arith.select %148, %145, %146 : vector<8x256xi1>, vector<8x256xbf16>
    %c3_87 = arith.constant 3 : index
    %c0_88 = arith.constant 0 : index
    %c0_89 = arith.constant 0 : index
    %150 = vector.load %arg3[%c3_87, %c0_88, %c0_89] : memref<9x8x8xbf16, #tpu.memory_space<vmem>>, vector<1x8x8xbf16>
    %151 = vector.shape_cast %150 : vector<1x8x8xbf16> to vector<8x8xbf16>
    %cst_90 = arith.constant dense<0.000000e+00> : vector<8x256xf32>
    %152 = tpu.matmul %151, %149, %cst_90 {dimension_numbers = #tpu.dot_dimension_numbers<[1], [0], [0], [1], [0, 0, 1, 1], [], []>} : vector<8x8xbf16>, vector<8x256xbf16>, vector<8x256xf32> -> vector<8x256xf32>
    %153 = arith.addf %144, %152 : vector<8x256xf32>
    %c0_91 = arith.constant 0 : index
    %c128_92 = arith.constant 128 : index
    %154 = vector.load %arg5[%c0_91, %c128_92] : memref<8x512xbf16, #tpu.memory_space<vmem>>, vector<8x256xbf16>
    %c4_93 = arith.constant 4 : index
    %c0_94 = arith.constant 0 : index
    %c0_95 = arith.constant 0 : index
    %155 = vector.load %arg3[%c4_93, %c0_94, %c0_95] : memref<9x8x8xbf16, #tpu.memory_space<vmem>>, vector<1x8x8xbf16>
    %156 = vector.shape_cast %155 : vector<1x8x8xbf16> to vector<8x8xbf16>
    %cst_96 = arith.constant dense<0.000000e+00> : vector<8x256xf32>
    %157 = tpu.matmul %156, %154, %cst_96 {dimension_numbers = #tpu.dot_dimension_numbers<[1], [0], [0], [1], [0, 0, 1, 1], [], []>} : vector<8x8xbf16>, vector<8x256xbf16>, vector<8x256xf32> -> vector<8x256xf32>
    %158 = arith.addf %153, %157 : vector<8x256xf32>
    %c0_97 = arith.constant 0 : index
    %c129_98 = arith.constant 129 : index
    %159 = vector.load %arg5[%c0_97, %c129_98] : memref<8x512xbf16, #tpu.memory_space<vmem>>, vector<8x256xbf16>
    %cst_99 = arith.constant 0.000000e+00 : bf16
    %160 = vector.broadcast %cst_99 : bf16 to vector<8x256xbf16>
    %161 = vector.shape_cast %20 : vector<1x256xi1> to vector<1x256xi1>
    %162 = vector.broadcast %161 : vector<1x256xi1> to vector<8x256xi1>
    %163 = arith.select %162, %159, %160 : vector<8x256xi1>, vector<8x256xbf16>
    %c5_100 = arith.constant 5 : index
    %c0_101 = arith.constant 0 : index
    %c0_102 = arith.constant 0 : index
    %164 = vector.load %arg3[%c5_100, %c0_101, %c0_102] : memref<9x8x8xbf16, #tpu.memory_space<vmem>>, vector<1x8x8xbf16>
    %165 = vector.shape_cast %164 : vector<1x8x8xbf16> to vector<8x8xbf16>
    %cst_103 = arith.constant dense<0.000000e+00> : vector<8x256xf32>
    %166 = tpu.matmul %165, %163, %cst_103 {dimension_numbers = #tpu.dot_dimension_numbers<[1], [0], [0], [1], [0, 0, 1, 1], [], []>} : vector<8x8xbf16>, vector<8x256xbf16>, vector<8x256xf32> -> vector<8x256xf32>
    %167 = arith.addf %158, %166 : vector<8x256xf32>
    %c0_104 = arith.constant 0 : index
    %c143_105 = arith.constant 143 : index
    %168 = vector.load %arg5[%c0_104, %c143_105] : memref<8x512xbf16, #tpu.memory_space<vmem>>, vector<8x256xbf16>
    %cst_106 = arith.constant 0.000000e+00 : bf16
    %169 = vector.broadcast %cst_106 : bf16 to vector<8x256xbf16>
    %170 = vector.shape_cast %18 : vector<1x256xi1> to vector<1x256xi1>
    %171 = vector.broadcast %170 : vector<1x256xi1> to vector<8x256xi1>
    %172 = arith.select %171, %168, %169 : vector<8x256xi1>, vector<8x256xbf16>
    %c6_107 = arith.constant 6 : index
    %c0_108 = arith.constant 0 : index
    %c0_109 = arith.constant 0 : index
    %173 = vector.load %arg3[%c6_107, %c0_108, %c0_109] : memref<9x8x8xbf16, #tpu.memory_space<vmem>>, vector<1x8x8xbf16>
    %174 = vector.shape_cast %173 : vector<1x8x8xbf16> to vector<8x8xbf16>
    %cst_110 = arith.constant dense<0.000000e+00> : vector<8x256xf32>
    %175 = tpu.matmul %174, %172, %cst_110 {dimension_numbers = #tpu.dot_dimension_numbers<[1], [0], [0], [1], [0, 0, 1, 1], [], []>} : vector<8x8xbf16>, vector<8x256xbf16>, vector<8x256xf32> -> vector<8x256xf32>
    %176 = arith.addf %167, %175 : vector<8x256xf32>
    %c0_111 = arith.constant 0 : index
    %c144_112 = arith.constant 144 : index
    %177 = vector.load %arg5[%c0_111, %c144_112] : memref<8x512xbf16, #tpu.memory_space<vmem>>, vector<8x256xbf16>
    %c7_113 = arith.constant 7 : index
    %c0_114 = arith.constant 0 : index
    %c0_115 = arith.constant 0 : index
    %178 = vector.load %arg3[%c7_113, %c0_114, %c0_115] : memref<9x8x8xbf16, #tpu.memory_space<vmem>>, vector<1x8x8xbf16>
    %179 = vector.shape_cast %178 : vector<1x8x8xbf16> to vector<8x8xbf16>
    %cst_116 = arith.constant dense<0.000000e+00> : vector<8x256xf32>
    %180 = tpu.matmul %179, %177, %cst_116 {dimension_numbers = #tpu.dot_dimension_numbers<[1], [0], [0], [1], [0, 0, 1, 1], [], []>} : vector<8x8xbf16>, vector<8x256xbf16>, vector<8x256xf32> -> vector<8x256xf32>
    %181 = arith.addf %176, %180 : vector<8x256xf32>
    %c0_117 = arith.constant 0 : index
    %c145_118 = arith.constant 145 : index
    %182 = vector.load %arg5[%c0_117, %c145_118] : memref<8x512xbf16, #tpu.memory_space<vmem>>, vector<8x256xbf16>
    %cst_119 = arith.constant 0.000000e+00 : bf16
    %183 = vector.broadcast %cst_119 : bf16 to vector<8x256xbf16>
    %184 = vector.shape_cast %20 : vector<1x256xi1> to vector<1x256xi1>
    %185 = vector.broadcast %184 : vector<1x256xi1> to vector<8x256xi1>
    %186 = arith.select %185, %182, %183 : vector<8x256xi1>, vector<8x256xbf16>
    %c8_120 = arith.constant 8 : index
    %c0_121 = arith.constant 0 : index
    %c0_122 = arith.constant 0 : index
    %187 = vector.load %arg3[%c8_120, %c0_121, %c0_122] : memref<9x8x8xbf16, #tpu.memory_space<vmem>>, vector<1x8x8xbf16>
    %188 = vector.shape_cast %187 : vector<1x8x8xbf16> to vector<8x8xbf16>
    %cst_123 = arith.constant dense<0.000000e+00> : vector<8x256xf32>
    %189 = tpu.matmul %188, %186, %cst_123 {dimension_numbers = #tpu.dot_dimension_numbers<[1], [0], [0], [1], [0, 0, 1, 1], [], []>} : vector<8x8xbf16>, vector<8x256xbf16>, vector<8x256xf32> -> vector<8x256xf32>
    %190 = arith.addf %181, %189 : vector<8x256xf32>
    %cst_124 = arith.constant dense<0.000000e+00> : vector<8xf32>
    %191 = vector.multi_reduction <add>, %190, %cst_124 [1] : vector<8x256xf32> to vector<8xf32>
    %192 = vector.shape_cast %191 : vector<8xf32> to vector<8x1xf32>
    %cst_125 = arith.constant 3.906250e-03 : f32
    %193 = vector.broadcast %cst_125 : f32 to vector<8x1xf32>
    %194 = arith.mulf %192, %193 : vector<8x1xf32>
    %195 = arith.mulf %190, %190 : vector<8x256xf32>
    %cst_126 = arith.constant dense<0.000000e+00> : vector<8xf32>
    %196 = vector.multi_reduction <add>, %195, %cst_126 [1] : vector<8x256xf32> to vector<8xf32>
    %197 = vector.shape_cast %196 : vector<8xf32> to vector<8x1xf32>
    %cst_127 = arith.constant 3.906250e-03 : f32
    %198 = vector.broadcast %cst_127 : f32 to vector<8x1xf32>
    %199 = arith.mulf %197, %198 : vector<8x1xf32>
    %200 = arith.mulf %194, %194 : vector<8x1xf32>
    %201 = arith.subf %199, %200 : vector<8x1xf32>
    %cst_128 = arith.constant 0.000000e+00 : f32
    %202 = vector.broadcast %cst_128 : f32 to vector<8x1xf32>
    %203 = arith.maximumf %201, %202 : vector<8x1xf32>
    %204 = vector.broadcast %194 : vector<8x1xf32> to vector<8x256xf32>
    %205 = arith.subf %190, %204 : vector<8x256xf32>
    %cst_129 = arith.constant 9.99999974E-6 : f32
    %206 = vector.broadcast %cst_129 : f32 to vector<8x1xf32>
    %207 = arith.addf %203, %206 : vector<8x1xf32>
    %208 = math.rsqrt %207 : vector<8x1xf32>
    %209 = vector.broadcast %208 : vector<8x1xf32> to vector<8x256xf32>
    %210 = arith.mulf %205, %209 : vector<8x256xf32>
    %cst_130 = arith.constant 0.000000e+00 : f32
    %211 = vector.broadcast %cst_130 : f32 to vector<8x256xf32>
    %212 = arith.cmpf oge, %210, %211 : vector<8x256xf32>
    %cst_131 = arith.constant 1.000000e-01 : f32
    %213 = vector.broadcast %cst_131 : f32 to vector<8x256xf32>
    %214 = arith.mulf %213, %210 : vector<8x256xf32>
    %215 = arith.select %212, %210, %214 : vector<8x256xi1>, vector<8x256xf32>
    %216 = vector.shape_cast %215 : vector<8x256xf32> to vector<1x8x256xf32>
    %c0_132 = arith.constant 0 : index
    %c0_133 = arith.constant 0 : index
    %c0_134 = arith.constant 0 : index
    %217 = vector.load %arg4[%c0_132, %c0_133, %c0_134] : memref<1x8x256xf32, #tpu.memory_space<vmem>>, vector<1x8x256xf32>
    tpu.vector_store %arg4[%c0_132, %c0_133, %c0_134], %216 {strides = array<i32>} : memref<1x8x256xf32, #tpu.memory_space<vmem>>, vector<1x8x256xf32>,
    return
  }
  func.func @transform_0(%arg0: i32) -> (i32, i32, i32) {
    %c0_i32 = arith.constant 0 : i32
    %c0_i32_0 = arith.constant 0 : i32
    %c0_i32_1 = arith.constant 0 : i32
    return %arg0, %c0_i32, %c0_i32_0 : i32, i32, i32
  }
  func.func @transform_1(%arg0: i32) -> (i32, i32, i32) {
    %c0_i32 = arith.constant 0 : i32
    %c0_i32_0 = arith.constant 0 : i32
    %c0_i32_1 = arith.constant 0 : i32
    %c0_i32_2 = arith.constant 0 : i32
    return %c0_i32, %c0_i32_0, %c0_i32_1 : i32, i32, i32
  }
  func.func @transform_2(%arg0: i32) -> (i32, i32, i32) {
    %c0_i32 = arith.constant 0 : i32
    %c0_i32_0 = arith.constant 0 : i32
    %c0_i32_1 = arith.constant 0 : i32
    %c0_i32_2 = arith.constant 0 : i32
    return %c0_i32, %c0_i32_0, %c0_i32_1 : i32, i32, i32
  }
  func.func @transform_3(%arg0: i32) -> (i32, i32, i32) {
    %c0_i32 = arith.constant 0 : i32
    %c0_i32_0 = arith.constant 0 : i32
    %c0_i32_1 = arith.constant 0 : i32
    return %arg0, %c0_i32, %c0_i32_0 : i32, i32, i32
  }
}

</mosaic_0001>

<bundles_post_ra>
// kernel: conv_block_forward.1
= control target key start
LH: loop header
LB: loop body
LE: loop exit
PB: predicated region body
PF: predicated region fallthrough
CT: control target
= control target key end

     0   :  { %s1916_s12 = smov 0   ;;  %s2274_s0 = inlined_call_operand.vmem [shape: f32[2,4,256], index: 0, kind: input, shape index: {}]   ;;  %s2275_s1 = inlined_call_operand.vmem [shape: bf16[9,8,4], index: 1, kind: input, shape index: {}]   ;;  %s2276_s2 = inlined_call_operand.vmem [shape: bf16[9,8,8], index: 2, kind: input, shape index: {}]   ;;  %s2277_s3 = inlined_call_operand.vmem [shape: f32[2,8,256], index: 3, kind: output, shape index: {}]  }
   0x1 LB: > { %s1658_s13 = sadd.s32 4294967295, %s1885_s12   ;;  %p1662_p0 = scmp.ge.s32.totalorder %s1885_s12, 1  ;;  %s1885_s12 = sphi %s1916_s12, %s13_s12  }
   0x2   : > { %p137_p1 = scmp.lt.s32.totalorder %s1885_s12, 3 }
   0x4   : > { %p138_p2 = pnand %p1662_p0, %p137_p1 }
   0x5   : > { %v174_v0 = vlaneseq (!%p138_p2)  ;;  %v1887_v1 = vmov (!%p138_p2), 0   ;;  %p161_p3 = scmp.lt.s32.totalorder (!%p138_p2), %s1658_s13, 1  ;;  %s1888_s18 = smov (!%p138_p2), 111   ;;  %vm231_vm6 = vcmask (!%p138_p2), 908288   ;;  %vm385_vm9 = vcmask (!%p138_p2), 924672  }
   0x6   : > { %141 = sbr.rel (%p138_p2) target bundleno = 1395 (0x573), region = 32  ;;  %205 = vst [vmem:[#allocation2] sm:$0xf] (!%p138_p2), %v1887_v1  ;;  %206 = vst [vmem:[#allocation2 + $0xc] sm:$0xf] (!%p138_p2), %v1887_v1  ;;  %300 = vmatprep.mubr.bf16.mxu0 (!%p138_p2), %v1887_v1  ;;  %1009 = vmatprep.mubr.bf16.mxu1 (!%p138_p2), %v1887_v1  ;;  %s1889_s19 = smov (!%p138_p2), 127  }
   0x7   : > { %v175_v2 = vand.u32 (!%p138_p2), 127, %v174_v0  ;;  %s1890_s20 = smov (!%p138_p2), 113   ;;  %s1891_s21 = smov (!%p138_p2), 1   ;;  %vm2283_vm10 = vcmask (!%p138_p2), 1039360   ;;  %vm2278_vm14 = vcmask (!%p138_p2), 130048   ;;  %vm487_vm15 = vcmask (!%p138_p2), 7168  }
   0x8   : > { %s1892_s22 = smov (!%p138_p2), 16   ;;  %s1893_s23 = smov (!%p138_p2), 15   ;;  %v1668_v54 = vld [vmem:[%s2275_s1 + $0x4] sm:$0xf] (!%p138_p2) }
   0x9   : > { %v176_v3 = vadd.s32 (!%p138_p2), 128, %v175_v2  ;;  %v181_v4 = vand.u32 (!%p138_p2), 15, %v175_v2  ;;  %s1894_s24 = smov (!%p138_p2), 17   ;;  %s1895_s27 = smov (!%p138_p2), 112  }
   0xb   : > { %v188_v5 = vand.u32 (!%p138_p2), 15, %v176_v3  ;;  %vm201_vm0 = vcmp.ne.s32.totalorder (!%p138_p2), %v181_v4, 0  ;;  %vm203_vm1 = vcmp.ne.s32.totalorder (!%p138_p2), %v181_v4, 15 }
   0xd   : > { %s2305_s13 = smov (!%p161_p3, %s1658_s13), 1  ;;  %vm202_vm2 = vcmp.ne.s32.totalorder %v188_v5, 0  ;;  %vm204_vm3 = vcmp.ne.s32.totalorder %v188_v5, 15  ;;  %v2017_v59 = vld [vmem:[#allocation2 + $0xc] sm:$0x3] }
   0xe   : > { %s1775_s14 = sshll.u32 %s2305_s13, 3  ;;  %vm226_vm4 = vmpackc.low %vm202_vm2, %vm201_vm0  ;;  %vm261_vm0 = vcmask 1041408   ;;  %vm407_vm2 = vcmask 121856   ;;  %s1776_s10 = sshll.u32 %s2305_s13, 4 }
   0xf   : > { %s165_s17 = scalar_lea.vmem %s2274_s0, %s1775_s14  ;;  %v227_v8 = vsel %vm226_vm4, 65537, %v1887_v1  ;;  %vm380_vm5 = vmpackc.low %vm204_vm3, %vm203_vm1  ;;  %vm257_vm4 = vcmask 31744   ;;  %s170_s15 = scalar_lea.vmem %s2277_s3, %s1776_s10 }
  0x10   : > { %v207_v6 = vld [vmem:[%s165_s17] sm:$0xff]  ;;  %228 = vrot.lane.b32.xlu0 %v227_v8, %s1888_s18  ;;  %462 = vrot.lane.b32.xlu1 %v227_v8, %s1889_s19  ;;  %v1938_v10 = vsel %vm380_vm5, 65537, %v1887_v1 }
  0x11   : > { %v209_v7 = vcombine.high %v207_v6, %v207_v6 }
  0x13   : > { %v1777_v9 = vpack.c.bf16 %v209_v7, %v207_v6 }
  0x14   : > { %382 = vrot.lane.b32.xlu0 %v1938_v10, %s1890_s20  ;;  %604 = vrot.lane.b32.xlu1 %v1938_v10, %s1891_s21 }
  0x15   : > { %219 = vst [vmem:[#allocation2 + $0x4] sm:$0x33] %v1777_v9  ;;  %v1711_v9 = vcombine.low %v2017_v59, %v2017_v59 }
  0x1c   : > { %v220_v11 = vld [vmem:[#allocation2] sm:$0x33]  ;;  %v221_v12 = vld [vmem:[#allocation2 + $0x8] sm:$0x3] }
  0x1d   : > { %v1670_v13 = vcombine.high %v220_v11, %v220_v11  ;;  %v1669_v14 = vcombine.low %v220_v11, %v220_v11  ;;  %v1671_v15 = vcombine.low %v221_v12, %v221_v12  ;;  %v1996_v52 = vld [vmem:[#allocation2 + $0x4] sm:$0x33] }
  0x1e   : > { %v1709_v7 = vcombine.low %v1996_v52, %v1996_v52 }
  0x1f   : > { %250 = vrot.lane.b32.xlu1 %v1670_v13, %s1892_s22  ;;  %248 = vrot.lane.b32.xlu0 %v1669_v14, %s1892_s22 }
  0x23   : > { %682 = vrot.lane.b32.xlu1 %v227_v8, %s1893_s23  ;;  %252 = vrot.lane.b32.xlu0 %v1671_v15, %s1892_s22  ;;  %v1710_v8 = vcombine.high %v1996_v52, %v1996_v52 }
  0x82   : > { %v229_v16 = vpop.permute.xlu0 %228  ;;  %v463_v17 = vpop.permute.xlu1 %462 }
  0x83   : > { %v230_v18 = vrot.slane %v229_v16, 4  ;;  %v464_v20 = vrot.slane %v463_v17, 4 }
  0x85   : > { %v1949_v19 = vsel %vm231_vm6, %v230_v18, %v229_v16  ;;  %vm1952_vm8 = vcmp.ne.s16.totalorder %v230_v18, 0  ;;  %v1968_v30 = vsel %vm2283_vm10, %v464_v20, %v463_v17  ;;  %vm1983_vm1 = vcmp.ne.s16.totalorder %v464_v20, 0  ;;  %v237_v17 = vld [vmem:[%s2275_s1] sm:$0xf] }
  0x86   : > { %vm233_vm7 = vcmp.ne.s16.totalorder %v1949_v19, 0  ;;  %v383_v22 = vpop.permute.xlu0 %382  ;;  %v236_v29 = vsel %vm1952_vm8, %v221_v12, 0  ;;  %v605_v31 = vpop.permute.xlu1 %604  ;;  %vm2281_vm13 = vcmp.ne.s16.totalorder %v1968_v30, 0  ;;  %v470_v49 = vsel %vm1983_vm1, %v221_v12, 0 }
  0x87   : > { %v235_v23 = vsel %vm233_vm7, %v220_v11, 0  ;;  %v384_v24 = vrot.slane %v383_v22, 4  ;;  %v1676_v35 = vcombine.low %v236_v29, %v236_v29  ;;  %v606_v36 = vrot.slane %v605_v31, 4 }
  0x88   : > { %v1675_v25 = vcombine.high %v235_v23, %v235_v23  ;;  %v1674_v26 = vcombine.low %v235_v23, %v235_v23  ;;  %v469_v40 = vsel %vm2281_vm13, %v220_v11, 0  ;;  %v1688_v55 = vcombine.low %v470_v49, %v470_v49 }
  0x89   : > { %v1959_v27 = vsel %vm385_vm9, %v384_v24, %v383_v22  ;;  %vm1961_vm11 = vcmp.ne.s16.totalorder %v384_v24, 0  ;;  %v1988_v44 = vsel %vm487_vm15, %v606_v36, %v605_v31  ;;  %v1686_v45 = vcombine.low %v469_v40, %v469_v40 }
  0x8a   : > { %vm2282_vm12 = vcmp.ne.s16.totalorder %v1959_v27, 0  ;;  %319 = vrot.lane.b32.xlu1 %v1675_v25, %s1894_s24  ;;  %317 = vrot.lane.b32.xlu0 %v1674_v26, %s1894_s24  ;;  %v390_v33 = vsel %vm1961_vm11, %v221_v12, 0  ;;  %vm2279_vm3 = vcmp.ne.s16.totalorder %v1988_v44, 0  ;;  %v1687_v56 = vcombine.high %v469_v40, %v469_v40 }
  0x8b   : > { %v389_v32 = vsel %vm2282_vm12, %v220_v11, 0  ;;  %v1682_v37 = vcombine.low %v390_v33, %v390_v33  ;;  %v610_v57 = vsel %vm2279_vm3, %v1996_v52, 0  ;;  %vm2012_vm5 = vcmp.ne.s16.totalorder %v606_v36, 0 }
  0x8c   : > { %v1680_v34 = vcombine.low %v389_v32, %v389_v32  ;;  %v1681_v42 = vcombine.high %v389_v32, %v389_v32  ;;  %v1697_v60 = vcombine.low %v610_v57, %v610_v57  ;;  %v1698_v61 = vcombine.high %v610_v57, %v610_v57 }
  0x8d   : > { %v611_v63 = vsel %vm2012_vm5, %v2017_v59, 0 }
  0x8e   : > { %401 = vrot.lane.b32.xlu1 %v1680_v34, %s1893_s23  ;;  %321 = vrot.lane.b32.xlu0 %v1676_v35, %s1894_s24  ;;  %v1699_v2 = vcombine.low %v611_v63, %v611_v63 }
  0x91   : > { %v251_v38 = vpop.permute.xlu1 %250  ;;  %v249_v39 = vpop.permute.xlu0 %248 }
  0x92   : > { %v255_v41 = vsel %vm2278_vm14, %v249_v39, %v251_v38  ;;  %405 = vrot.lane.b32.xlu1 %v1682_v37, %s1893_s23  ;;  %403 = vrot.lane.b32.xlu0 %v1681_v42, %s1893_s23  ;;  %v1679_v42 = vld [vmem:[%s2275_s1 + $0x8] sm:$0xf] }
  0x93   : > { %v263_v48 = vsel %vm261_vm0, %v255_v41, 0 }
  0x95   : > { %v683_v46 = vpop.permute.xlu1 %682  ;;  %v253_v47 = vpop.permute.xlu0 %252 }
  0x96   : > { %v684_v50 = vrot.slane %v683_v46, 4  ;;  %v256_v51 = vsel %vm2278_vm14, %v251_v38, %v253_v47  ;;  %831 = vrot.lane.b32.xlu0 %v1938_v10, %s1894_s24  ;;  %481 = vrot.lane.b32.xlu1 %v1686_v45, %s1891_s21  ;;  %v542_v38 = vld [vmem:[#allocation2 + $0x4] sm:$0x33] }
  0x97   : > { %1672 = vmatprep.subr.msk.bf16.mxu0 %vm261_vm0, %v256_v51  ;;  %v1692_v49 = vcombine.low %v542_v38, %v542_v38 }
  0x98   : > { %v2001_v53 = vsel %vm407_vm2, %v684_v50, %v683_v46  ;;  %269 = vmatpush1.bf16.msra.mxu0 %v263_v48  ;;  %vm2029_vm3 = vcmp.ne.s16.totalorder %v684_v50, 0  ;;  %v1693_v46 = vcombine.high %v542_v38, %v542_v38 }
  0x99   : > { %vm2280_vm14 = vcmp.ne.s16.totalorder %v2001_v53, 0  ;;  %v689_v4 = vsel %vm2029_vm3, %v2017_v59, 0 }
  0x9a   : > { %485 = vrot.lane.b32.xlu1 %v1688_v55, %s1891_s21  ;;  %483 = vrot.lane.b32.xlu0 %v1687_v56, %s1891_s21  ;;  %v688_v62 = vsel %vm2280_vm14, %v1996_v52, 0  ;;  %v1705_v5 = vcombine.low %v689_v4, %v689_v4  ;;  %vm323_vm14 = vcmask 138240  }
  0x9b   : > { %1673 = vmatmul.mubr.msk.bf16.vlgmr.msra.gmra.mrb[0].mxu0 %vm257_vm4, %v1668_v54  ;;  %v1703_v3 = vcombine.low %v688_v62, %v688_v62  ;;  %v1704_v6 = vcombine.high %v688_v62, %v688_v62  ;;  %v554_v54 = vsel %vm261_vm0, %v1692_v49, 0 }
  0x9c   : > { %367 = vmatprep.mubr.bf16.mxu0 %v1887_v1 }
  0x9e   : > { %622 = vrot.lane.b32.xlu0 %v1697_v60, %s1889_s19  ;;  %624 = vrot.lane.b32.xlu1 %v1698_v61, %s1889_s19  ;;  %v1691_v61 = vld [vmem:[%s2275_s1 + $0x10] sm:$0xf] }
  0xa2   : > { %626 = vrot.lane.b32.xlu0 %v1699_v2, %s1889_s19  ;;  %700 = vrot.lane.b32.xlu1 %v1703_v3, %s1890_s20 }
  0xa6   : > { %704 = vrot.lane.b32.xlu1 %v1705_v5, %s1890_s20  ;;  %702 = vrot.lane.b32.xlu0 %v1704_v6, %s1890_s20  ;;  %v1696_v6 = vld [vmem:[%s2275_s1 + $0x14] sm:$0xf] }
  0xaa   : > { %770 = vrot.lane.b32.xlu0 %v1709_v7, %s1895_s27  ;;  %772 = vrot.lane.b32.xlu1 %v1710_v8, %s1895_s27 }
  0xae   : > { %774 = vrot.lane.b32.xlu0 %v1711_v9, %s1895_s27 }
  0xfc   : > { %v320_v10 = vpop.permute.xlu1 %319  ;;  %v318_v11 = vpop.permute.xlu0 %317 }
  0xfd   : > { %v324_v12 = vsel %vm323_vm14, %v318_v11, %v320_v10 }
  0xfe   : > { %v330_v16 = vsel %vm261_vm0, %v324_v12, 0  ;;  %v1708_v12 = vld [vmem:[%s2275_s1 + $0x1c] sm:$0xf] }
 0x100   : > { %v402_v13 = vpop.permute.xlu1 %401  ;;  %v322_v14 = vpop.permute.xlu0 %321 }
 0x101   : > { %v325_v15 = vsel %vm323_vm14, %v320_v10, %v322_v14  ;;  %v1702_v10 = vld [vmem:[%s2275_s1 + $0x18] sm:$0xf] }
 0x102   : > { %1677 = vmatprep.subr.msk.bf16.mxu0 %vm261_vm0, %v325_v15 }
 0x103   : > { %336 = vmatpush1.bf16.msra.mxu0 %v330_v16 }
 0x104   : > { %v406_v18 = vpop.permute.xlu1 %405  ;;  %v404_v20 = vpop.permute.xlu0 %403 }
 0x105   : > { %v408_v22 = vsel %vm407_vm2, %v402_v13, %v404_v20  ;;  %v409_v23 = vsel %vm407_vm2, %v404_v20, %v406_v18  ;;  %v1714_v20 = vld [vmem:[%s2275_s1 + $0x20] sm:$0xf] }
 0x106   : > { %v414_v24 = vsel %vm261_vm0, %v408_v22, 0  ;;  %1683 = vmatprep.subr.msk.bf16.mxu0 %vm261_vm0, %v409_v23  ;;  %1678 = vmatmul.mubr.msk.bf16.vlgmr.msra.gmra.mrb[0].mxu0 %vm257_vm4, %v237_v17 }
 0x107   : > { %420 = vmatpush1.bf16.msra.mxu0 %v414_v24  ;;  %451 = vmatprep.mubr.bf16.mxu0 %v1887_v1 }
 0x108   : > { %v832_v25 = vpop.permute.xlu0 %831  ;;  %v482_v26 = vpop.permute.xlu1 %481 }
 0x109   : > { %v833_v29 = vrot.slane %v832_v25, 4 }
 0x10b   : > { %v2065_v31 = vsel %vm323_vm14, %v833_v29, %v832_v25  ;;  %vm2068_vm12 = vcmp.ne.s16.totalorder %v833_v29, 0 }
 0x10c   : > { %vm835_vm13 = vcmp.ne.s16.totalorder %v2065_v31, 0  ;;  %v486_v33 = vpop.permute.xlu1 %485  ;;  %v484_v34 = vpop.permute.xlu0 %483  ;;  %v838_v41 = vsel %vm2068_vm12, %v2017_v59, 0 }
 0x10d   : > { %v837_v35 = vsel %vm835_vm13, %v1996_v52, 0  ;;  %v488_v36 = vsel %vm487_vm15, %v482_v26, %v484_v34  ;;  %v489_v37 = vsel %vm487_vm15, %v484_v34, %v486_v33  ;;  %v1717_v47 = vcombine.low %v838_v41, %v838_v41  ;;  %v1685_v52 = vld [vmem:[%s2275_s1 + $0xc] sm:$0xf] }
 0x10e   : > { %v1716_v39 = vcombine.high %v837_v35, %v837_v35  ;;  %v1715_v40 = vcombine.low %v837_v35, %v837_v35  ;;  %1689 = vmatprep.subr.msk.bf16.mxu0 %vm261_vm0, %v489_v37  ;;  %v494_v45 = vsel %vm261_vm0, %v488_v36, 0 }
 0x110   : > { %851 = vrot.lane.b32.xlu0 %v1716_v39, %s1888_s18  ;;  %849 = vrot.lane.b32.xlu1 %v1715_v40, %s1888_s18  ;;  %v623_v48 = vpop.permute.xlu0 %622  ;;  %v625_v50 = vpop.permute.xlu1 %624 }
 0x111   : > { %v628_v57 = vsel %vm2283_vm10, %v623_v48, %v625_v50 }
 0x112   : > { %1684 = vmatmul.mubr.msk.bf16.vlgmr.msra.gmra.mrb[0].mxu0 %vm257_vm4, %v1679_v42  ;;  %v634_v62 = vsel %vm261_vm0, %v628_v57, 0 }
 0x113   : > { %500 = vmatpush1.bf16.msra.mxu0 %v494_v45  ;;  %531 = vmatprep.mubr.bf16.mxu0 %v1887_v1 }
 0x114   : > { %853 = vrot.lane.b32.xlu1 %v1717_v47, %s1888_s18  ;;  %1694 = vmatprep.subr.msk.bf16.mxu0 %vm261_vm0, %v1693_v46  ;;  %v627_v51 = vpop.permute.xlu0 %626  ;;  %v701_v56 = vpop.permute.xlu1 %700 }
 0x115   : > { %v629_v55 = vsel %vm2283_vm10, %v625_v50, %v627_v51  ;;  %vm776_vm10 = vcmask 916480  }
 0x118   : > { %v705_v59 = vpop.permute.xlu1 %704  ;;  %v703_v60 = vpop.permute.xlu0 %702 }
 0x119   : > { %v707_v63 = vsel %vm385_vm9, %v703_v60, %v705_v59  ;;  %v706_v3 = vsel %vm385_vm9, %v701_v56, %v703_v60 }
 0x11a   : > { %v712_v7 = vsel %vm261_vm0, %v706_v3, 0 }
 0x11c   : > { %v771_v2 = vpop.permute.xlu0 %770  ;;  %v773_v4 = vpop.permute.xlu1 %772 }
 0x11d   : > { %v777_v9 = vsel %vm776_vm10, %v771_v2, %v773_v4 }
 0x11e   : > { %1690 = vmatmul.mubr.msk.bf16.vlgmr.msra.gmra.mrb[0].mxu0 %vm257_vm4, %v1685_v52  ;;  %v783_v11 = vsel %vm261_vm0, %v777_v9, 0 }
 0x11f   : > { %560 = vmatpush1.bf16.msra.mxu0 %v554_v54  ;;  %591 = vmatprep.mubr.bf16.mxu0 %v1887_v1 }
 0x120   : > { %1700 = vmatprep.subr.msk.bf16.mxu0 %vm261_vm0, %v629_v55  ;;  %v775_v5 = vpop.permute.xlu0 %774 }
 0x121   : > { %v778_v8 = vsel %vm776_vm10, %v773_v4, %v775_v5 }
 0x12a   : > { %1695 = vmatmul.mubr.msk.bf16.vlgmr.msra.gmra.mrb[0].mxu0 %vm257_vm4, %v1691_v61 }
 0x12b   : > { %640 = vmatpush1.bf16.msra.mxu0 %v634_v62  ;;  %671 = vmatprep.mubr.bf16.mxu0 %v1887_v1 }
 0x12c   : > { %1706 = vmatprep.subr.msk.bf16.mxu0 %vm261_vm0, %v707_v63 }
 0x136   : > { %1701 = vmatmul.mubr.msk.bf16.vlgmr.msra.gmra.mrb[0].mxu0 %vm257_vm4, %v1696_v6 }
 0x137   : > { %718 = vmatpush1.bf16.msra.mxu0 %v712_v7  ;;  %749 = vmatprep.mubr.bf16.mxu0 %v1887_v1 }
 0x138   : > { %1712 = vmatprep.subr.msk.bf16.mxu0 %vm261_vm0, %v778_v8 }
 0x142   : > { %1707 = vmatmul.mubr.msk.bf16.vlgmr.msra.gmra.mrb[0].mxu0 %vm257_vm4, %v1702_v10 }
 0x143   : > { %789 = vmatpush1.bf16.msra.mxu0 %v783_v11  ;;  %820 = vmatprep.mubr.bf16.mxu0 %v1887_v1 }
 0x14e   : > { %1713 = vmatmul.mubr.msk.bf16.vlgmr.msra.gmra.mrb[0].mxu0 %vm257_vm4, %v1708_v12 }
 0x14f   : > { %898 = vmatprep.mubr.bf16.mxu0 %v1887_v1 }
 0x182   : > { %v850_v13 = vpop.permute.xlu1 %849  ;;  %v852_v14 = vpop.permute.xlu0 %851 }
 0x183   : > { %v855_v15 = vsel %vm231_vm6, %v850_v13, %v852_v14 }
 0x184   : > { %v861_v18 = vsel %vm261_vm0, %v855_v15, 0 }
 0x186   : > { %v854_v16 = vpop.permute.xlu1 %853 }
 0x187   : > { %v856_v17 = vsel %vm231_vm6, %v852_v14, %v854_v16 }
 0x188   : > { %1718 = vmatprep.subr.msk.bf16.mxu0 %vm261_vm0, %v856_v17 }
 0x189   : > { %867 = vmatpush1.bf16.msra.mxu0 %v861_v18 }
 0x18c   : > { %1719 = vmatmul.mubr.msk.bf16.vlgmr.msra.gmra.mrb[0].mxu0 %vm257_vm4, %v1714_v20 }
 0x25f   : > { %v900_v22 = vpop.f32.mrb[0].mxu0 }
 0x260   : > { %v902_v23 = vpop.f32.mrb[1].mxu0  ;;  %v913_v24 = vmul.f32 %v900_v22, %v900_v22 }
 0x261   : > { %v904_v25 = vpop.f32.mrb[2].mxu0  ;;  %v909_v26 = vadd.f32 %v902_v23, %v900_v22  ;;  %v914_v29 = vmul.f32 %v902_v23, %v902_v23 }
 0x262   : > { %v905_v33 = vpop.f32.mrb[3].mxu0 }
 0x263   : > { %910 = vadd.xlane.f32.xlu0 %v909_v26  ;;  %v915_v34 = vadd.f32 %v914_v29, %v913_v24 }
 0x265   : > { %916 = vadd.xlane.f32.xlu1 %v915_v34 }
 0x2f0   : > { %v911_v35 = vpop.xlane.xlu0 %910 }
 0x2f1   : > { %v912_v36 = vmul.f32 0.00390625, %v911_v35 }
 0x2f2   : > { %v917_v37 = vpop.xlane.xlu1 %916 }
 0x2f3   : > { %v918_v38 = vmul.f32 0.00390625, %v917_v37  ;;  %v919_v39 = vmul.f32 %v912_v36, %v912_v36  ;;  %v922_v45 = vsub.f32 %v900_v22, %v912_v36  ;;  %v923_v46 = vsub.f32 %v902_v23, %v912_v36  ;;  %v1721_v36 = vld [vmem:[%s2276_s2 + $0x4] sm:$0xf] }
 0x2f5   : > { %v920_v40 = vsub.f32 %v918_v38, %v919_v39 }
 0x2f7   : > { %v921_v41 = vmax.f32 %v920_v40, 0.0 }
 0x2f9   : > { %v924_v42 = vadd.f32 1e-05, %v921_v41 }
 0x2fb   : > { %1873 = vrsqrt.f32 %v924_v42 }
 0x305   : > { %v1874_v47 = vpop.eup %1873 }
 0x306   : > { %v926_v48 = vmul.f32 %v1874_v47, %v922_v45  ;;  %v927_v49 = vmul.f32 %v1874_v47, %v923_v46 }
 0x308   : > { %vm928_vm0 = vcmp.ge.f32.partialorder %v926_v48, 0.0  ;;  %vm929_vm4 = vcmp.ge.f32.partialorder %v927_v49, 0.0  ;;  %v930_v50 = vmul.f32 0.1, %v926_v48  ;;  %v931_v51 = vmul.f32 0.1, %v927_v49 }
 0x30a   : > { %v932_v52 = vsel %vm928_vm0, %v926_v48, %v930_v50  ;;  %v933_v54 = vsel %vm929_vm4, %v927_v49, %v931_v51  ;;  %vm2296_vm0 = vcmp.ne.s16.totalorder %v1959_v27, 0  ;;  %v947_v50 = vld [vmem:[%s2276_s2] sm:$0xf] }
 0x30b   : > { %v1778_v55 = vpack.c.bf16 %v933_v54, %v932_v52  ;;  %v1878_v58 = vpack.c.bf16 %v933_v54, %v933_v54 }
 0x30d   : > { %942 = vst [vmem:[#allocation2 + $0x4] sm:$0xff] %v1778_v55  ;;  %v1504_v20 = vsel %vm835_vm13, %v1778_v55, 0  ;;  %vm2300_vm13 = vcmask 130048  }
 0x30e   : > { %v1768_v22 = vcombine.low %v1504_v20, %v1504_v20  ;;  %v1769_v24 = vcombine.high %v1504_v20, %v1504_v20  ;;  %v1767_v20 = vld [vmem:[%s2276_s2 + $0x20] sm:$0xf] }
 0x314   : > { %v943_v56 = vld [vmem:[#allocation2] sm:$0xff]  ;;  %v944_v60 = vld [vmem:[#allocation2 + $0x8] sm:$0xf] }
 0x315   : > { %v1723_v57 = vcombine.high %v943_v56, %v943_v56  ;;  %v1722_v59 = vcombine.low %v943_v56, %v943_v56  ;;  %v945_v61 = vsel %vm233_vm7, %v943_v56, 0  ;;  %v1724_v62 = vcombine.low %v944_v60, %v944_v60 }
 0x316   : > { %v1727_v63 = vcombine.low %v945_v61, %v945_v61  ;;  %v946_v2 = vsel %vm1952_vm8, %v944_v60, 0  ;;  %v1728_v3 = vcombine.high %v945_v61, %v945_v61  ;;  %v1084_v5 = vsel %vm2296_vm0, %v943_v56, 0  ;;  %v1738_v61 = vld [vmem:[%s2276_s2 + $0xc] sm:$0xf] }
 0x317   : > { %960 = vrot.lane.b32.xlu1 %v1723_v57, %s1892_s22  ;;  %958 = vrot.lane.b32.xlu0 %v1722_v59, %s1892_s22  ;;  %v1729_v4 = vcombine.low %v946_v2, %v946_v2  ;;  %v1733_v19 = vcombine.low %v1084_v5, %v1084_v5  ;;  %v1734_v6 = vcombine.high %v1084_v5, %v1084_v5  ;;  %v1085_v7 = vsel %vm1961_vm11, %v944_v60, 0  ;;  %v1732_v57 = vld [vmem:[%s2276_s2 + $0x8] sm:$0xf] }
 0x318   : > { %vm2297_vm7 = vcmp.ne.s16.totalorder %v1968_v30, 0  ;;  %v1735_v8 = vcombine.low %v1085_v7, %v1085_v7  ;;  %v1157_v27 = vsel %vm1983_vm1, %v944_v60, 0  ;;  %vm2298_vm8 = vcmp.ne.s16.totalorder %v1988_v44, 0  ;;  %v1289_v30 = vld [vmem:[#allocation2 + $0xc] sm:$0xf]  ;;  %vm2301_vm1 = vmmov %vm2300_vm13 }
 0x319   : > { %v1156_v21 = vsel %vm2297_vm7, %v943_v56, 0  ;;  %v1741_v11 = vcombine.low %v1157_v27, %v1157_v27  ;;  %v1290_v28 = vsel %vm2298_vm8, %v1778_v55, 0  ;;  %v1291_v43 = vsel %vm2012_vm5, %v1289_v30, 0 }
 0x31a   : > { %v1739_v9 = vcombine.low %v1156_v21, %v1156_v21  ;;  %v1740_v10 = vcombine.high %v1156_v21, %v1156_v21  ;;  %v1750_v12 = vcombine.low %v1290_v28, %v1290_v28  ;;  %v1751_v13 = vcombine.high %v1290_v28, %v1290_v28 }
 0x31b   : > { %962 = vrot.lane.b32.xlu0 %v1724_v62, %s1892_s22  ;;  %1026 = vrot.lane.b32.xlu1 %v1727_v63, %s1894_s24  ;;  %vm2299_vm11 = vcmp.ne.s16.totalorder %v2001_v53, 0  ;;  %v1752_v15 = vcombine.low %v1291_v43, %v1291_v43  ;;  %v1363_v16 = vsel %vm2029_vm3, %v1289_v30, 0  ;;  %v2175_v53 = vpack.c.bf16 %v932_v52, %v932_v52 }
 0x31c   : > { %v1362_v14 = vsel %vm2299_vm11, %v1778_v55, 0  ;;  %v1758_v18 = vcombine.low %v1363_v16, %v1363_v16  ;;  %v1764_v0 = vcombine.low %v1289_v30, %v1289_v30  ;;  %v1505_v23 = vsel %vm2068_vm12, %v1289_v30, 0 }
 0x31d   : > { %v1756_v44 = vcombine.low %v1362_v14, %v1362_v14  ;;  %v1757_v17 = vcombine.high %v1362_v14, %v1362_v14  ;;  %v1770_v25 = vcombine.low %v1505_v23, %v1505_v23  ;;  %vm970_vm3 = vcmask 1043456   ;;  %v1755_v14 = vld [vmem:[%s2276_s2 + $0x18] sm:$0xf] }
 0x31e   : > { %vm966_vm12 = vcmask 64512   ;;  %v1240_v2 = vsel %vm970_vm3, %v2175_v53, 0 }
 0x31f   : > { %1028 = vrot.lane.b32.xlu0 %v1728_v3, %s1894_s24  ;;  %1030 = vrot.lane.b32.xlu1 %v1729_v4, %s1894_s24 }
 0x323   : > { %1096 = vrot.lane.b32.xlu0 %v1733_v19, %s1893_s23  ;;  %1098 = vrot.lane.b32.xlu1 %v1734_v6, %s1893_s23  ;;  %v1744_v19 = vld [vmem:[%s2276_s2 + $0x10] sm:$0xf] }
 0x327   : > { %1100 = vrot.lane.b32.xlu0 %v1735_v8, %s1893_s23  ;;  %1168 = vrot.lane.b32.xlu1 %v1739_v9, %s1891_s21 }
 0x32b   : > { %1170 = vrot.lane.b32.xlu0 %v1740_v10, %s1891_s21  ;;  %1172 = vrot.lane.b32.xlu1 %v1741_v11, %s1891_s21  ;;  %v1749_v10 = vld [vmem:[%s2276_s2 + $0x14] sm:$0xf] }
 0x32f   : > { %1302 = vrot.lane.b32.xlu0 %v1750_v12, %s1889_s19  ;;  %1304 = vrot.lane.b32.xlu1 %v1751_v13, %s1889_s19 }
 0x333   : > { %1306 = vrot.lane.b32.xlu0 %v1752_v15, %s1889_s19  ;;  %1374 = vrot.lane.b32.xlu1 %v1756_v44, %s1890_s20 }
 0x337   : > { %1376 = vrot.lane.b32.xlu0 %v1757_v17, %s1890_s20  ;;  %1378 = vrot.lane.b32.xlu1 %v1758_v18, %s1890_s20 }
 0x33b   : > { %1444 = vrot.lane.b32.xlu0 %v2175_v53, %s1895_s27  ;;  %1446 = vrot.lane.b32.xlu1 %v1878_v58, %s1895_s27  ;;  %v1761_v53 = vld [vmem:[%s2276_s2 + $0x1c] sm:$0xf] }
 0x33f   : > { %1448 = vrot.lane.b32.xlu0 %v1764_v0, %s1895_s27  ;;  %1516 = vrot.lane.b32.xlu1 %v1768_v22, %s1888_s18 }
 0x343   : > { %1518 = vrot.lane.b32.xlu0 %v1769_v24, %s1888_s18  ;;  %1520 = vrot.lane.b32.xlu1 %v1770_v25, %s1888_s18 }
 0x389   : > { %v961_v31 = vpop.permute.xlu1 %960  ;;  %v959_v26 = vpop.permute.xlu0 %958 }
 0x38a   : > { %v964_v29 = vsel %vm2300_vm13, %v959_v26, %v961_v31 }
 0x38b   : > { %v972_v32 = vsel %vm970_vm3, %v964_v29, 0 }
 0x38d   : > { %v963_v33 = vpop.permute.xlu0 %962  ;;  %v1027_v34 = vpop.permute.xlu1 %1026 }
 0x38e   : > { %v965_v35 = vsel %vm2301_vm1, %v961_v31, %v963_v33 }
 0x38f   : > { %1725 = vmatprep.subr.msk.bf16.mxu1 %vm970_vm3, %v965_v35 }
 0x390   : > { %978 = vmatpush1.bf16.msra.mxu1 %v972_v32 }
 0x391   : > { %v1029_v37 = vpop.permute.xlu0 %1028  ;;  %v1031_v38 = vpop.permute.xlu1 %1030 }
 0x392   : > { %v1032_v39 = vsel %vm323_vm14, %v1027_v34, %v1029_v37  ;;  %v1033_v40 = vsel %vm323_vm14, %v1029_v37, %v1031_v38  ;;  %vm2302_vm14 = vcmask 1039360  }
 0x393   : > { %v1038_v41 = vsel %vm970_vm3, %v1032_v39, 0  ;;  %1726 = vmatmul.mubr.msk.bf16.vlgmr.msra.gmra.mrb[0].mxu1 %vm966_vm12, %v1721_v36  ;;  %1730 = vmatprep.subr.msk.bf16.mxu1 %vm970_vm3, %v1033_v40 }
 0x394   : > { %1044 = vmatpush1.bf16.msra.mxu1 %v1038_v41  ;;  %1075 = vmatprep.mubr.bf16.mxu1 %v1887_v1 }
 0x395   : > { %v1097_v42 = vpop.permute.xlu0 %1096  ;;  %v1099_v45 = vpop.permute.xlu1 %1098 }
 0x396   : > { %v1102_v49 = vsel %vm407_vm2, %v1097_v42, %v1099_v45 }
 0x397   : > { %v1108_v55 = vsel %vm970_vm3, %v1102_v49, 0 }
 0x399   : > { %v1101_v46 = vpop.permute.xlu0 %1100  ;;  %v1169_v47 = vpop.permute.xlu1 %1168 }
 0x39a   : > { %v1103_v48 = vsel %vm407_vm2, %v1099_v45, %v1101_v46 }
 0x39b   : > { %1736 = vmatprep.subr.msk.bf16.mxu1 %vm970_vm3, %v1103_v48 }
 0x39d   : > { %v1171_v51 = vpop.permute.xlu0 %1170  ;;  %v1173_v52 = vpop.permute.xlu1 %1172 }
 0x39e   : > { %v1175_v54 = vsel %vm487_vm15, %v1171_v51, %v1173_v52  ;;  %v1174_v56 = vsel %vm487_vm15, %v1169_v47, %v1171_v51  ;;  %vm2303_vm15 = vmmov %vm2302_vm14 }
 0x39f   : > { %1731 = vmatmul.mubr.msk.bf16.vlgmr.msra.gmra.mrb[0].mxu1 %vm966_vm12, %v947_v50  ;;  %v1180_v59 = vsel %vm970_vm3, %v1174_v56, 0 }
 0x3a0   : > { %1114 = vmatpush1.bf16.msra.mxu1 %v1108_v55  ;;  %1145 = vmatprep.mubr.bf16.mxu1 %v1887_v1 }
 0x3a1   : > { %1742 = vmatprep.subr.msk.bf16.mxu1 %vm970_vm3, %v1175_v54  ;;  %v1303_v60 = vpop.permute.xlu0 %1302  ;;  %v1305_v62 = vpop.permute.xlu1 %1304 }
 0x3a2   : > { %v1308_v5 = vsel %vm2303_vm15, %v1303_v60, %v1305_v62 }
 0x3a3   : > { %v1314_v21 = vsel %vm970_vm3, %v1308_v5, 0 }
 0x3a5   : > { %v1307_v63 = vpop.permute.xlu0 %1306  ;;  %v1375_v4 = vpop.permute.xlu1 %1374 }
 0x3a6   : > { %v1309_v3 = vsel %vm2302_vm14, %v1305_v62, %v1307_v63 }
 0x3a9   : > { %v1377_v6 = vpop.permute.xlu0 %1376  ;;  %v1379_v7 = vpop.permute.xlu1 %1378 }
 0x3aa   : > { %v1381_v8 = vsel %vm385_vm9, %v1377_v6, %v1379_v7  ;;  %v1380_v27 = vsel %vm385_vm9, %v1375_v4, %v1377_v6 }
 0x3ab   : > { %1737 = vmatmul.mubr.msk.bf16.vlgmr.msra.gmra.mrb[0].mxu1 %vm966_vm12, %v1732_v57  ;;  %v1386_v30 = vsel %vm970_vm3, %v1380_v27, 0 }
 0x3ac   : > { %1186 = vmatpush1.bf16.msra.mxu1 %v1180_v59  ;;  %1217 = vmatprep.mubr.bf16.mxu1 %v1887_v1 }
 0x3ad   : > { %1747 = vmatprep.subr.msk.bf16.mxu1 %vm970_vm3, %v1878_v58  ;;  %v1445_v9 = vpop.permute.xlu0 %1444  ;;  %v1447_v11 = vpop.permute.xlu1 %1446 }
 0x3ae   : > { %v1450_v43 = vsel %vm776_vm10, %v1445_v9, %v1447_v11 }
 0x3af   : > { %v1456_v16 = vsel %vm970_vm3, %v1450_v43, 0 }
 0x3b1   : > { %v1449_v28 = vpop.permute.xlu0 %1448  ;;  %v1517_v13 = vpop.permute.xlu1 %1516 }
 0x3b2   : > { %v1451_v12 = vsel %vm776_vm10, %v1447_v11, %v1449_v28 }
 0x3b5   : > { %v1519_v15 = vpop.permute.xlu0 %1518  ;;  %v1521_v44 = vpop.permute.xlu1 %1520 }
 0x3b6   : > { %v1523_v17 = vsel %vm231_vm6, %v1519_v15, %v1521_v44  ;;  %v1522_v18 = vsel %vm231_vm6, %v1517_v13, %v1519_v15 }
 0x3b7   : > { %1743 = vmatmul.mubr.msk.bf16.vlgmr.msra.gmra.mrb[0].mxu1 %vm966_vm12, %v1738_v61  ;;  %v1528_v58 = vsel %vm970_vm3, %v1522_v18, 0 }
 0x3b8   : > { %1246 = vmatpush1.bf16.msra.mxu1 %v1240_v2  ;;  %1277 = vmatprep.mubr.bf16.mxu1 %v1887_v1 }
 0x3b9   : > { %1753 = vmatprep.subr.msk.bf16.mxu1 %vm970_vm3, %v1309_v3 }
 0x3c3   : > { %1748 = vmatmul.mubr.msk.bf16.vlgmr.msra.gmra.mrb[0].mxu1 %vm966_vm12, %v1744_v19 }
 0x3c4   : > { %1320 = vmatpush1.bf16.msra.mxu1 %v1314_v21  ;;  %1351 = vmatprep.mubr.bf16.mxu1 %v1887_v1 }
 0x3c5   : > { %1759 = vmatprep.subr.msk.bf16.mxu1 %vm970_vm3, %v1381_v8 }
 0x3cf   : > { %1754 = vmatmul.mubr.msk.bf16.vlgmr.msra.gmra.mrb[0].mxu1 %vm966_vm12, %v1749_v10 }
 0x3d0   : > { %1392 = vmatpush1.bf16.msra.mxu1 %v1386_v30  ;;  %1423 = vmatprep.mubr.bf16.mxu1 %v1887_v1 }
 0x3d1   : > { %1765 = vmatprep.subr.msk.bf16.mxu1 %vm970_vm3, %v1451_v12 }
 0x3db   : > { %1760 = vmatmul.mubr.msk.bf16.vlgmr.msra.gmra.mrb[0].mxu1 %vm966_vm12, %v1755_v14 }
 0x3dc   : > { %1462 = vmatpush1.bf16.msra.mxu1 %v1456_v16  ;;  %1493 = vmatprep.mubr.bf16.mxu1 %v1887_v1 }
 0x3dd   : > { %1771 = vmatprep.subr.msk.bf16.mxu1 %vm970_vm3, %v1523_v17 }
 0x3e7   : > { %1766 = vmatmul.mubr.msk.bf16.vlgmr.msra.gmra.mrb[0].mxu1 %vm966_vm12, %v1761_v53 }
 0x3e8   : > { %1534 = vmatpush1.bf16.msra.mxu1 %v1528_v58  ;;  %1565 = vmatprep.mubr.bf16.mxu1 %v1887_v1 }
 0x3f3   : > { %1772 = vmatmul.mubr.msk.bf16.vlgmr.msra.gmra.mrb[0].mxu1 %vm966_vm12, %v1767_v20 }
 0x4c6   : > { %v1567_v0 = vpop.f32.mrb[0].mxu1 }
 0x4c7   : > { %v1569_v22 = vpop.f32.mrb[1].mxu1  ;;  %v1580_v23 = vmul.f32 %v1567_v0, %v1567_v0 }
 0x4c8   : > { %v1571_v24 = vpop.f32.mrb[2].mxu1  ;;  %v1576_v25 = vadd.f32 %v1569_v22, %v1567_v0  ;;  %v1581_v31 = vmul.f32 %v1569_v22, %v1569_v22 }
 0x4c9   : > { %v1572_v26 = vpop.f32.mrb[3].mxu1 }
 0x4ca   : > { %1577 = vadd.xlane.f32.xlu0 %v1576_v25  ;;  %v1582_v29 = vadd.f32 %v1581_v31, %v1580_v23 }
 0x4cc   : > { %1583 = vadd.xlane.f32.xlu1 %v1582_v29 }
 0x557   : > { %v1578_v33 = vpop.xlane.xlu0 %1577 }
 0x558   : > { %v1579_v34 = vmul.f32 0.00390625, %v1578_v33 }
 0x559   : > { %v1584_v1 = vpop.xlane.xlu1 %1583 }
 0x55a   : > { %v1585_v35 = vmul.f32 0.00390625, %v1584_v1  ;;  %v1586_v32 = vmul.f32 %v1579_v34, %v1579_v34  ;;  %v1589_v39 = vsub.f32 %v1567_v0, %v1579_v34  ;;  %v1590_v40 = vsub.f32 %v1569_v22, %v1579_v34 }
 0x55c   : > { %v1587_v36 = vsub.f32 %v1585_v35, %v1586_v32 }
 0x55e   : > { %v1588_v37 = vmax.f32 %v1587_v36, 0.0 }
 0x560   : > { %v1591_v38 = vadd.f32 1e-05, %v1588_v37 }
 0x562   : > { %1875 = vrsqrt.f32 %v1591_v38 }
 0x56c   : > { %v1876_v41 = vpop.eup %1875 }
 0x56d   : > { %v1593_v42 = vmul.f32 %v1876_v41, %v1589_v39  ;;  %v1594_v45 = vmul.f32 %v1876_v41, %v1590_v40 }
 0x56f   : > { %vm1595_vm6 = vcmp.ge.f32.partialorder %v1593_v42, 0.0  ;;  %vm1596_vm9 = vcmp.ge.f32.partialorder %v1594_v45, 0.0  ;;  %v1597_v46 = vmul.f32 0.1, %v1593_v42  ;;  %v1598_v47 = vmul.f32 0.1, %v1594_v45 }
 0x571   : > { %v1599_v48 = vsel %vm1595_vm6, %v1593_v42, %v1597_v46  ;;  %v1600_v49 = vsel %vm1596_vm9, %v1594_v45, %v1598_v47 }
 0x572   : > { %1601 = vst [vmem:[%s170_s15] sm:$0xff] %v1599_v48  ;;  %1602 = vst [vmem:[%s170_s15 + $0x8] sm:$0xff] %v1600_v49 }
 0x573 PF: > { %s13_s12 = sadd.s32 1, %s1885_s12  }
 0x574   : > { %p10_p4 = scmp.ge.s32.totalorder %s13_s12, 4  }
 0x576   :  { %12 = sbr.rel (!%p10_p4) target bundleno = 1 (0x1), region = 78 }

</bundles_post_ra>
